<compile_context>
chip_gen: v7x
topology: tpu7x:2x2x1
jax: 0.10.0
libtpu: 0.0.40
codegen_flags: <defaults>
</compile_context>

<pallas_src>
import functools

import jax
import jax.numpy as jnp
import numpy as np
from jax.experimental import pallas as pl
from jax.experimental.pallas import tpu as pltpu

LOW_THRESHOLD = 60.0
HIGH_THRESHOLD = 100.0
EPS = 1e-8
SHIFT = 80.0          # center of the heart-rate range; keeps the single-pass
                      # variance (sum_x2 - sum_x^2/B) free of f32 cancellation.
LANES = 128
SUB_ROWS = 8          # sub-tile = one (8,128) f32 vreg
MAX_BLOCK_ROWS = 64   # up to 64*128 = 8192 samples per grid step

# accumulator slots inside the (N_ACC, 8, 128) VMEM scratch
_SL1, _D2, _AD, _R, _R2, _T, _T2, _W, _WCE, _CORR = range(10)
N_ACC = 10

_STAT_NAMES = ("total_loss", "regression_loss", "rmse", "raw_mae",
               "classification_loss", "classification_accuracy",
               "distribution_loss", "mean_matching_loss", "std_matching_loss")


def _loss_kernel(reg_ref, tgt_ref, logits_ref, out_ref, acc_ref, *,
                 batch, num_blocks, beta, reg_w, cls_w, dist_w, class_w):
    i = pl.program_id(0)
    rb = reg_ref.shape[0]                 # block rows (multiple of SUB_ROWS)
    nsub = rb // SUB_ROWS
    num_classes = logits_ref.shape[0]
    block_elems = rb * LANES
    has_tail = (num_blocks * block_elems) != batch     # compile-time bool

    @pl.when(i == 0)
    def _init():
        acc_ref[...] = jnp.zeros_like(acc_ref)

    def subtile_partials(s, masked):
        """Per-stat (SUB_ROWS, LANES) contributions of sub-tile s of this block."""
        row0 = pl.multiple_of(s * SUB_ROWS, SUB_ROWS)
        r = reg_ref[pl.ds(row0, SUB_ROWS), :].astype(jnp.float32)
        t = tgt_ref[pl.ds(row0, SUB_ROWS), :].astype(jnp.float32)
        lgblk = logits_ref[:, pl.ds(row0, SUB_ROWS), :].astype(jnp.float32)
        lg = [lgblk[c] for c in range(num_classes)]      # class-major, static idx

        # ---- regression pieces (Smooth L1 / squared / absolute errors) ------
        d = r - t
        ad = jnp.abs(d)
        sl1 = jnp.where(ad < beta, (0.5 / beta) * d * d, ad - 0.5 * beta)
        d2 = d * d

        # ---- classification pieces (weighted CE + accuracy) -----------------
        # heart_rate_to_class: 0 if hr < 60, 1 if 60 <= hr < 100, 2 if hr >= 100;
        # invalid classes (cls >= C) remapped to min(2, C-1) like the reference.
        cls = ((t >= LOW_THRESHOLD).astype(jnp.int32)
               + (t >= HIGH_THRESHOLD).astype(jnp.int32))
        cls = jnp.minimum(cls, num_classes - 1)

        maxl = lg[0]
        for c in range(1, num_classes):
            maxl = jnp.maximum(maxl, lg[c])
        sexp = jnp.exp(lg[0] - maxl)
        for c in range(1, num_classes):
            sexp = sexp + jnp.exp(lg[c] - maxl)
        lse = maxl + jnp.log(sexp)

        tgt_logit = lg[0]
        w_i = jnp.full_like(maxl, float(class_w[0]))
        for c in range(1, num_classes):
            sel = cls == c
            tgt_logit = jnp.where(sel, lg[c], tgt_logit)
            w_i = jnp.where(sel, float(class_w[c]), w_i)
        ce_i = lse - tgt_logit

        # argmax over classes, first occurrence (matches torch.max tie-break)
        pred = jnp.zeros_like(cls)
        for c in range(num_classes - 1, -1, -1):
            pred = jnp.where(lg[c] == maxl, c, pred)
        correct = (pred == cls).astype(jnp.float32)

        # ---- shifted sums for the single-pass mean / std ---------------------
        rs = r - SHIFT
        ts = t - SHIFT

        if masked:
            # Only the last block can contain padded-tail samples; the host
            # zero-pads, so lse/ce_i stay finite and multiplicative masking of
            # w_i / correct / sums is sufficient.
            row = jax.lax.broadcasted_iota(jnp.int32, (SUB_ROWS, LANES), 0)
            lane = jax.lax.broadcasted_iota(jnp.int32, (SUB_ROWS, LANES), 1)
            gidx = i * block_elems + (s * SUB_ROWS + row) * LANES + lane
            validf = (gidx < batch).astype(jnp.float32)
            sl1 = sl1 * validf
            d2 = d2 * validf
            ad = ad * validf
            rs = rs * validf
            ts = ts * validf
            w_i = w_i * validf
            correct = correct * validf

        return (sl1, d2, ad, rs, rs * rs, ts, ts * ts, w_i, w_i * ce_i, correct)

    def accumulate(masked):
        def body(s, carry):
            parts = subtile_partials(s, masked)
            return tuple(c + p for c, p in zip(carry, parts))

        init = tuple(jnp.zeros((SUB_ROWS, LANES), jnp.float32)
                     for _ in range(N_ACC))
        parts = jax.lax.fori_loop(0, nsub, body, init, unroll=True)
        # one aligned, unmasked (8,128) RMW per stat, once per grid step
        for k in range(N_ACC):
            acc_ref[k] += parts[k]

    if not has_tail:
        accumulate(masked=False)                 # every block fully valid
    elif num_blocks == 1:
        accumulate(masked=True)                  # single (partially valid) block
    else:
        @pl.when(i < num_blocks - 1)
        def _interior():
            accumulate(masked=False)             # fully-valid fast path

        @pl.when(i == num_blocks - 1)
        def _tail():
            accumulate(masked=True)              # masked tail block

    # ---------------- finalize on the last grid step -------------------------
    @pl.when(i == num_blocks - 1)
    def _finalize():
        acc = acc_ref[...]                                   # (N_ACC, 8, 128)
        acc_rows = jnp.sum(acc, axis=1, keepdims=True)       # (N_ACC, 1, 128)
        tot_all = jnp.sum(acc_rows, axis=2, keepdims=True)   # (N_ACC, 1, 1)

        def tot(k):
            return tot_all[k]                                # (1, 1)

        inv_b = 1.0 / batch                                  # compile-time consts
        inv_bm1 = 1.0 / (batch - 1)

        reg_loss = tot(_SL1) * inv_b
        mse = tot(_D2) * inv_b
        rmse = jnp.sqrt(mse + EPS)
        mae = tot(_AD) * inv_b

        ce = tot(_WCE) / tot(_W)                             # exact divide (once)
        accuracy = tot(_CORR) * inv_b

        s_r = tot(_R)
        s_t = tot(_T)
        r_mean = s_r * inv_b
        t_mean = s_t * inv_b
        mean_loss = (r_mean - t_mean) ** 2                   # shift cancels in diff
        r_var = jnp.maximum((tot(_R2) - s_r * r_mean) * inv_bm1, 0.0)
        t_var = jnp.maximum((tot(_T2) - s_t * t_mean) * inv_bm1, 0.0)
        std_loss = (jnp.sqrt(r_var) - jnp.sqrt(t_var)) ** 2
        dist = mean_loss + std_loss

        total_loss = reg_w * reg_loss + cls_w * ce + dist_w * dist

        stats = (total_loss, reg_loss, rmse, mae, ce, accuracy,
                 dist, mean_loss, std_loss)
        lane1 = jax.lax.broadcasted_iota(jnp.int32, (1, LANES), 1)
        out = jnp.zeros((1, LANES), jnp.float32)
        for k, s in enumerate(stats):
            out = jnp.where(lane1 == k, s, out)
        out_ref[...] = out                                   # single lane-dense store


@functools.partial(jax.jit,
                   static_argnames=("reg_w", "cls_w", "dist_w", "beta", "class_w"))
def _loss_jit(logits, regression, targets, *, reg_w, cls_w, dist_w, beta, class_w):
    targets = targets.reshape(-1)
    regression = regression.reshape(-1)
    B = targets.shape[0]
    C = logits.shape[1]
    assert B > 1, "distribution loss branch requires batch_size > 1"
    assert len(class_w) == C

    r_total = pl.cdiv(B, LANES)
    r_rows = pl.cdiv(r_total, SUB_ROWS) * SUB_ROWS        # multiple of SUB_ROWS
    r_blk = min(MAX_BLOCK_ROWS, r_rows)
    num_blocks = pl.cdiv(r_rows, r_blk)
    r_pad = num_blocks * r_blk
    pad = r_pad * LANES - B

    # Lane-dense / class-major layouts; zero padding keeps lse finite for the
    # padded tail.  Under jit these layout ops fuse with the kernel launch
    # (no standalone HBM round-trips).  Native dtype is kept; kernel casts.
    reg2 = jnp.pad(regression, (0, pad)).reshape(r_pad, LANES)
    tgt2 = jnp.pad(targets, (0, pad)).reshape(r_pad, LANES)
    lg3 = jnp.pad(logits.T, ((0, 0), (0, pad))).reshape(C, r_pad, LANES)

    kernel = functools.partial(
        _loss_kernel, batch=B, num_blocks=num_blocks, beta=float(beta),
        reg_w=float(reg_w), cls_w=float(cls_w), dist_w=float(dist_w),
        class_w=class_w)

    # TODO(synk): on v7x a leading size-2 "parallel" grid axis could split very
    # large batches across the two TensorCores with a tiny cross-core combine;
    # skipped here since per-step overhead dominates at these batch sizes.
    out = pl.pallas_call(
        kernel,
        out_shape=jax.ShapeDtypeStruct((1, LANES), jnp.float32),
        grid=(num_blocks,),
        in_specs=[
            pl.BlockSpec((r_blk, LANES), lambda i: (i, 0)),
            pl.BlockSpec((r_blk, LANES), lambda i: (i, 0)),
            pl.BlockSpec((C, r_blk, LANES), lambda i: (0, i, 0)),
        ],
        out_specs=pl.BlockSpec((1, LANES), lambda i: (0, 0)),
        scratch_shapes=[pltpu.VMEM((N_ACC, SUB_ROWS, LANES), jnp.float32)],
        compiler_params=pltpu.CompilerParams(
            dimension_semantics=("arbitrary",)),
    )(reg2, tgt2, lg3)

    stats = out[0, :len(_STAT_NAMES)]              # one small slice of the output
    loss_dict = {name: stats[k] for k, name in enumerate(_STAT_NAMES)}
    return stats[0], loss_dict


def multi_task_heart_rate_loss(logits, regression, targets, *,
                               regression_weight=1.0,
                               classification_weight=1.0,
                               distribution_weight=0.5,
                               beta=1.0,
                               class_weights=None):
    """Pallas equivalent of MultiTaskHeartRateLoss.forward((logits, regression), targets)."""
    # TODO(synk): the logits/regression == None branches and the host-side
    # warning print for invalid classes exist only in the PyTorch reference;
    # the kernel assumes both heads are present (invalid classes are still
    # remapped to min(2, C-1) like the reference, minus the print).
    C = int(logits.shape[1])
    if class_weights is None:
        cw = (1.0,) * C
    else:
        cw = tuple(float(w) for w in np.asarray(class_weights).reshape(-1))
        assert len(cw) == C
    return _loss_jit(logits, regression, targets,
                     reg_w=float(regression_weight),
                     cls_w=float(classification_weight),
                     dist_w=float(distribution_weight),
                     beta=float(beta), class_w=cw)


def _reference(logits, regression, targets, *, regression_weight, classification_weight,
               distribution_weight, beta, class_weights):
    """Pure-JAX reference for verification."""
    regression = regression.reshape(-1).astype(jnp.float32)
    targets = targets.reshape(-1).astype(jnp.float32)
    B = targets.shape[0]
    C = logits.shape[1]

    d = regression - targets
    ad = jnp.abs(d)
    sl1 = jnp.where(ad < beta, 0.5 * d * d / beta, ad - 0.5 * beta)
    reg_loss = jnp.mean(sl1)
    rmse = jnp.sqrt(jnp.mean(d * d) + EPS)
    mae = jnp.mean(ad)

    cls = ((targets >= LOW_THRESHOLD).astype(jnp.int32)
           + (targets >= HIGH_THRESHOLD).astype(jnp.int32))
    cls = jnp.minimum(cls, C - 1)
    logp = jax.nn.log_softmax(logits.astype(jnp.float32), axis=1)
    cw = jnp.ones((C,)) if class_weights is None else jnp.asarray(class_weights, jnp.float32)
    w_i = cw[cls]
    ce = jnp.sum(w_i * (-logp[jnp.arange(B), cls])) / jnp.sum(w_i)
    acc = jnp.mean((jnp.argmax(logits, axis=1) == cls).astype(jnp.float32))

    mean_l = (jnp.mean(regression) - jnp.mean(targets)) ** 2
    std_l = (jnp.std(regression, ddof=1) - jnp.std(targets, ddof=1)) ** 2
    dist = mean_l + std_l

    total = (regression_weight * reg_loss + classification_weight * ce
             + distribution_weight * dist)
    return total, reg_loss, rmse, mae, ce, acc, dist, mean_l, std_l


if __name__ == "__main__":
    key = jax.random.PRNGKey(0)

    params = dict(regression_weight=1.0, classification_weight=1.0,
                  distribution_weight=0.5, beta=1.0,
                  class_weights=(0.8, 1.0, 1.2))

    def run_case(B, C, k):
        k1, k2, k3 = jax.random.split(k, 3)
        targets = jax.random.uniform(k1, (B,), minval=45.0, maxval=120.0,
                                     dtype=jnp.float32)
        regression = targets + 5.0 * jax.random.normal(k2, (B,), dtype=jnp.float32)
        logits = jax.random.normal(k3, (B, C), dtype=jnp.float32)

        total, ld = multi_task_heart_rate_loss(logits, regression, targets, **params)
        jax.block_until_ready(total)

        got = np.array([float(ld[name]) for name in _STAT_NAMES])
        ref = np.array([float(x) for x in
                        _reference(logits, regression, targets, **params)])
        np.testing.assert_allclose(got, ref, rtol=2e-3, atol=2e-3)

    # small single-block batch with a masked tail
    run_case(8, 3, jax.random.fold_in(key, 0))
    # multi-sub-tile single block with a masked tail
    run_case(2500, 3, jax.random.fold_in(key, 1))
    # multi-block batch: exercises the fully-valid fast path + masked tail block
    run_case(8200, 3, jax.random.fold_in(key, 2))
    print("KERNEL_OK")
</pallas_src>

<mosaic_0001>
module attributes {stable_mosaic.version = 11 : i64} {
  func.func @_loss_kernel(%arg0: i32, %arg1: memref<8x128xf32, #tpu.memory_space<vmem>>, %arg2: memref<8x128xf32, #tpu.memory_space<vmem>>, %arg3: memref<3x8x128xf32, #tpu.memory_space<vmem>>, %arg4: memref<1x128xf32, #tpu.memory_space<vmem>>, %arg5: memref<10x8x128xf32, #tpu.memory_space<vmem>>) attributes {dimension_semantics = [#tpu.dimension_semantics<arbitrary>], iteration_bounds = array<i64: 1>, scalar_prefetch = 0 : i64, scratch_operands = 1 : i64, tpu.core_type = #tpu.core_type<tc>, window_params = [{transform_indices = @transform_0, window_bounds = array<i64: 8, 128>}, {transform_indices = @transform_1, window_bounds = array<i64: 8, 128>}, {transform_indices = @transform_2, window_bounds = array<i64: 3, 8, 128>}, {pipeline_mode = #tpu.pipeline_mode<synchronous>, transform_indices = @transform_3, window_bounds = array<i64: 1, 128>}]} {
    %c0_i32 = arith.constant 0 : i32
    %0 = arith.cmpi eq, %arg0, %c0_i32 : i32
    %1 = arith.extui %0 : i1 to i32
    %c0_i32_0 = arith.constant 0 : i32
    %2 = arith.cmpi ne, %1, %c0_i32_0 : i32
    scf.if %2 {
      %cst_85 = arith.constant 0.000000e+00 : f32
      %186 = vector.broadcast %cst_85 : f32 to vector<10x8x128xf32>
      %c0_86 = arith.constant 0 : index
      %c0_87 = arith.constant 0 : index
      %c0_88 = arith.constant 0 : index
      %187 = vector.load %arg5[%c0_86, %c0_87, %c0_88] : memref<10x8x128xf32, #tpu.memory_space<vmem>>, vector<10x8x128xf32>
      tpu.vector_store %arg5[%c0_86, %c0_87, %c0_88], %186 {strides = array<i32>} : memref<10x8x128xf32, #tpu.memory_space<vmem>>, vector<10x8x128xf32>,
    } else {
    }
    %cst = arith.constant 0.000000e+00 : f32
    %3 = vector.broadcast %cst : f32 to vector<8x128xf32>
    %cst_1 = arith.constant 0.000000e+00 : f32
    %4 = vector.broadcast %cst_1 : f32 to vector<8x128xf32>
    %cst_2 = arith.constant 0.000000e+00 : f32
    %5 = vector.broadcast %cst_2 : f32 to vector<8x128xf32>
    %cst_3 = arith.constant 0.000000e+00 : f32
    %6 = vector.broadcast %cst_3 : f32 to vector<8x128xf32>
    %cst_4 = arith.constant 0.000000e+00 : f32
    %7 = vector.broadcast %cst_4 : f32 to vector<8x128xf32>
    %cst_5 = arith.constant 0.000000e+00 : f32
    %8 = vector.broadcast %cst_5 : f32 to vector<8x128xf32>
    %cst_6 = arith.constant 0.000000e+00 : f32
    %9 = vector.broadcast %cst_6 : f32 to vector<8x128xf32>
    %cst_7 = arith.constant 0.000000e+00 : f32
    %10 = vector.broadcast %cst_7 : f32 to vector<8x128xf32>
    %cst_8 = arith.constant 0.000000e+00 : f32
    %11 = vector.broadcast %cst_8 : f32 to vector<8x128xf32>
    %cst_9 = arith.constant 0.000000e+00 : f32
    %12 = vector.broadcast %cst_9 : f32 to vector<8x128xf32>
    %c0_i32_10 = arith.constant 0 : i32
    %c8_i32 = arith.constant 8 : i32
    %13 = arith.muli %c0_i32_10, %c8_i32 : i32
    %14 = tpu.assume_multiple %13, 8 : i32
    %15 = arith.index_cast %14 : i32 to index
    %c0 = arith.constant 0 : index
    %16 = vector.load %arg1[%15, %c0] : memref<8x128xf32, #tpu.memory_space<vmem>>, vector<8x128xf32>
    %17 = arith.index_cast %14 : i32 to index
    %c0_11 = arith.constant 0 : index
    %18 = vector.load %arg2[%17, %c0_11] : memref<8x128xf32, #tpu.memory_space<vmem>>, vector<8x128xf32>
    %c0_12 = arith.constant 0 : index
    %19 = arith.index_cast %14 : i32 to index
    %c0_13 = arith.constant 0 : index
    %20 = vector.load %arg3[%c0_12, %19, %c0_13] : memref<3x8x128xf32, #tpu.memory_space<vmem>>, vector<3x8x128xf32>
    %21 = vector.extract_strided_slice %20 {offsets = [0, 0, 0], sizes = [1, 8, 128], strides = [1, 1, 1]} : vector<3x8x128xf32> to vector<1x8x128xf32>
    %22 = vector.shape_cast %21 : vector<1x8x128xf32> to vector<8x128xf32>
    %23 = vector.extract_strided_slice %20 {offsets = [1, 0, 0], sizes = [1, 8, 128], strides = [1, 1, 1]} : vector<3x8x128xf32> to vector<1x8x128xf32>
    %24 = vector.shape_cast %23 : vector<1x8x128xf32> to vector<8x128xf32>
    %25 = vector.extract_strided_slice %20 {offsets = [2, 0, 0], sizes = [1, 8, 128], strides = [1, 1, 1]} : vector<3x8x128xf32> to vector<1x8x128xf32>
    %26 = vector.shape_cast %25 : vector<1x8x128xf32> to vector<8x128xf32>
    %27 = arith.subf %16, %18 : vector<8x128xf32>
    %28 = math.absf %27 : vector<8x128xf32>
    %cst_14 = arith.constant 1.000000e+00 : f32
    %29 = vector.broadcast %cst_14 : f32 to vector<8x128xf32>
    %30 = arith.cmpf olt, %28, %29 : vector<8x128xf32>
    %cst_15 = arith.constant 5.000000e-01 : f32
    %31 = vector.broadcast %cst_15 : f32 to vector<8x128xf32>
    %32 = arith.mulf %31, %27 : vector<8x128xf32>
    %33 = arith.mulf %32, %27 : vector<8x128xf32>
    %cst_16 = arith.constant 5.000000e-01 : f32
    %34 = vector.broadcast %cst_16 : f32 to vector<8x128xf32>
    %35 = arith.subf %28, %34 : vector<8x128xf32>
    %36 = arith.select %30, %33, %35 : vector<8x128xi1>, vector<8x128xf32>
    %37 = arith.mulf %27, %27 : vector<8x128xf32>
    %cst_17 = arith.constant 6.000000e+01 : f32
    %38 = vector.broadcast %cst_17 : f32 to vector<8x128xf32>
    %39 = arith.cmpf oge, %18, %38 : vector<8x128xf32>
    %40 = arith.extui %39 : vector<8x128xi1> to vector<8x128xi32>
    %cst_18 = arith.constant 1.000000e+02 : f32
    %41 = vector.broadcast %cst_18 : f32 to vector<8x128xf32>
    %42 = arith.cmpf oge, %18, %41 : vector<8x128xf32>
    %43 = arith.extui %42 : vector<8x128xi1> to vector<8x128xi32>
    %44 = arith.addi %40, %43 : vector<8x128xi32>
    %c2_i32 = arith.constant 2 : i32
    %45 = vector.broadcast %c2_i32 : i32 to vector<8x128xi32>
    %46 = arith.minsi %44, %45 : vector<8x128xi32>
    %47 = arith.maximumf %22, %24 : vector<8x128xf32>
    %48 = arith.maximumf %47, %26 : vector<8x128xf32>
    %49 = arith.subf %22, %48 : vector<8x128xf32>
    %50 = math.exp %49 : vector<8x128xf32>
    %51 = arith.subf %24, %48 : vector<8x128xf32>
    %52 = math.exp %51 : vector<8x128xf32>
    %53 = arith.addf %50, %52 : vector<8x128xf32>
    %54 = arith.subf %26, %48 : vector<8x128xf32>
    %55 = math.exp %54 : vector<8x128xf32>
    %56 = arith.addf %53, %55 : vector<8x128xf32>
    %57 = math.log %56 : vector<8x128xf32>
    %58 = arith.addf %48, %57 : vector<8x128xf32>
    %cst_19 = arith.constant 8.000000e-01 : f32
    %59 = vector.broadcast %cst_19 : f32 to vector<8x128xf32>
    %c1_i32 = arith.constant 1 : i32
    %60 = vector.broadcast %c1_i32 : i32 to vector<8x128xi32>
    %61 = arith.cmpi eq, %46, %60 : vector<8x128xi32>
    %62 = arith.select %61, %24, %22 : vector<8x128xi1>, vector<8x128xf32>
    %cst_20 = arith.constant 1.000000e+00 : f32
    %63 = vector.broadcast %cst_20 : f32 to vector<8x128xf32>
    %64 = arith.select %61, %63, %59 : vector<8x128xi1>, vector<8x128xf32>
    %c2_i32_21 = arith.constant 2 : i32
    %65 = vector.broadcast %c2_i32_21 : i32 to vector<8x128xi32>
    %66 = arith.cmpi eq, %46, %65 : vector<8x128xi32>
    %67 = arith.select %66, %26, %62 : vector<8x128xi1>, vector<8x128xf32>
    %cst_22 = arith.constant 1.200000e+00 : f32
    %68 = vector.broadcast %cst_22 : f32 to vector<8x128xf32>
    %69 = arith.select %66, %68, %64 : vector<8x128xi1>, vector<8x128xf32>
    %70 = arith.subf %58, %67 : vector<8x128xf32>
    %c0_i32_23 = arith.constant 0 : i32
    %71 = vector.broadcast %c0_i32_23 : i32 to vector<8x128xi32>
    %72 = arith.cmpf oeq, %26, %48 : vector<8x128xf32>
    %c2_i32_24 = arith.constant 2 : i32
    %73 = vector.broadcast %c2_i32_24 : i32 to vector<8x128xi32>
    %74 = arith.select %72, %73, %71 : vector<8x128xi1>, vector<8x128xi32>
    %75 = arith.cmpf oeq, %24, %48 : vector<8x128xf32>
    %c1_i32_25 = arith.constant 1 : i32
    %76 = vector.broadcast %c1_i32_25 : i32 to vector<8x128xi32>
    %77 = arith.select %75, %76, %74 : vector<8x128xi1>, vector<8x128xi32>
    %78 = arith.cmpf oeq, %22, %48 : vector<8x128xf32>
    %c0_i32_26 = arith.constant 0 : i32
    %79 = vector.broadcast %c0_i32_26 : i32 to vector<8x128xi32>
    %80 = arith.select %78, %79, %77 : vector<8x128xi1>, vector<8x128xi32>
    %81 = arith.cmpi eq, %80, %46 : vector<8x128xi32>
    %82 = arith.extui %81 : vector<8x128xi1> to vector<8x128xi32>
    %83 = arith.sitofp %82 : vector<8x128xi32> to vector<8x128xf32>
    %cst_27 = arith.constant 8.000000e+01 : f32
    %84 = vector.broadcast %cst_27 : f32 to vector<8x128xf32>
    %85 = arith.subf %16, %84 : vector<8x128xf32>
    %cst_28 = arith.constant 8.000000e+01 : f32
    %86 = vector.broadcast %cst_28 : f32 to vector<8x128xf32>
    %87 = arith.subf %18, %86 : vector<8x128xf32>
    %88 = tpu.iota {dimensions = array<i32: 0>} : vector<8x128xi32>
    %89 = tpu.iota {dimensions = array<i32: 1>} : vector<8x128xi32>
    %c1024_i32 = arith.constant 1024 : i32
    %90 = arith.muli %arg0, %c1024_i32 : i32
    %c8_i32_29 = arith.constant 8 : i32
    %91 = arith.muli %c0_i32_10, %c8_i32_29 : i32
    %92 = vector.broadcast %91 : i32 to vector<8x128xi32>
    %93 = arith.addi %92, %88 : vector<8x128xi32>
    %c128_i32 = arith.constant 128 : i32
    %94 = vector.broadcast %c128_i32 : i32 to vector<8x128xi32>
    %95 = arith.muli %93, %94 : vector<8x128xi32>
    %96 = vector.broadcast %90 : i32 to vector<8x128xi32>
    %97 = arith.addi %96, %95 : vector<8x128xi32>
    %98 = arith.addi %97, %89 : vector<8x128xi32>
    %c8_i32_30 = arith.constant 8 : i32
    %99 = vector.broadcast %c8_i32_30 : i32 to vector<8x128xi32>
    %100 = arith.cmpi slt, %98, %99 : vector<8x128xi32>
    %101 = arith.extui %100 : vector<8x128xi1> to vector<8x128xi32>
    %102 = arith.sitofp %101 : vector<8x128xi32> to vector<8x128xf32>
    %103 = arith.mulf %36, %102 : vector<8x128xf32>
    %104 = arith.mulf %37, %102 : vector<8x128xf32>
    %105 = arith.mulf %28, %102 : vector<8x128xf32>
    %106 = arith.mulf %85, %102 : vector<8x128xf32>
    %107 = arith.mulf %87, %102 : vector<8x128xf32>
    %108 = arith.mulf %69, %102 : vector<8x128xf32>
    %109 = arith.mulf %83, %102 : vector<8x128xf32>
    %110 = arith.mulf %106, %106 : vector<8x128xf32>
    %111 = arith.mulf %107, %107 : vector<8x128xf32>
    %112 = arith.mulf %108, %70 : vector<8x128xf32>
    %113 = arith.addf %3, %103 : vector<8x128xf32>
    %114 = arith.addf %4, %104 : vector<8x128xf32>
    %115 = arith.addf %5, %105 : vector<8x128xf32>
    %116 = arith.addf %6, %106 : vector<8x128xf32>
    %117 = arith.addf %7, %110 : vector<8x128xf32>
    %118 = arith.addf %8, %107 : vector<8x128xf32>
    %119 = arith.addf %9, %111 : vector<8x128xf32>
    %120 = arith.addf %10, %108 : vector<8x128xf32>
    %121 = arith.addf %11, %112 : vector<8x128xf32>
    %122 = arith.addf %12, %109 : vector<8x128xf32>
    %c1_i32_31 = arith.constant 1 : i32
    %c0_32 = arith.constant 0 : index
    %c0_33 = arith.constant 0 : index
    %c0_34 = arith.constant 0 : index
    %123 = vector.load %arg5[%c0_32, %c0_33, %c0_34] : memref<10x8x128xf32, #tpu.memory_space<vmem>>, vector<1x8x128xf32>
    %124 = vector.shape_cast %123 : vector<1x8x128xf32> to vector<8x128xf32>
    %125 = arith.addf %124, %113 : vector<8x128xf32>
    %c0_35 = arith.constant 0 : index
    %c0_36 = arith.constant 0 : index
    %c0_37 = arith.constant 0 : index
    %126 = vector.load %arg5[%c0_35, %c0_36, %c0_37] : memref<10x8x128xf32, #tpu.memory_space<vmem>>, vector<1x8x128xf32>
    %127 = vector.shape_cast %126 : vector<1x8x128xf32> to vector<8x128xf32>
    %128 = vector.shape_cast %125 : vector<8x128xf32> to vector<1x8x128xf32>
    tpu.vector_store %arg5[%c0_35, %c0_36, %c0_37], %128 {strides = array<i32>} : memref<10x8x128xf32, #tpu.memory_space<vmem>>, vector<1x8x128xf32>,
    %c1 = arith.constant 1 : index
    %c0_38 = arith.constant 0 : index
    %c0_39 = arith.constant 0 : index
    %129 = vector.load %arg5[%c1, %c0_38, %c0_39] : memref<10x8x128xf32, #tpu.memory_space<vmem>>, vector<1x8x128xf32>
    %130 = vector.shape_cast %129 : vector<1x8x128xf32> to vector<8x128xf32>
    %131 = arith.addf %130, %114 : vector<8x128xf32>
    %c1_40 = arith.constant 1 : index
    %c0_41 = arith.constant 0 : index
    %c0_42 = arith.constant 0 : index
    %132 = vector.load %arg5[%c1_40, %c0_41, %c0_42] : memref<10x8x128xf32, #tpu.memory_space<vmem>>, vector<1x8x128xf32>
    %133 = vector.shape_cast %132 : vector<1x8x128xf32> to vector<8x128xf32>
    %134 = vector.shape_cast %131 : vector<8x128xf32> to vector<1x8x128xf32>
    tpu.vector_store %arg5[%c1_40, %c0_41, %c0_42], %134 {strides = array<i32>} : memref<10x8x128xf32, #tpu.memory_space<vmem>>, vector<1x8x128xf32>,
    %c2 = arith.constant 2 : index
    %c0_43 = arith.constant 0 : index
    %c0_44 = arith.constant 0 : index
    %135 = vector.load %arg5[%c2, %c0_43, %c0_44] : memref<10x8x128xf32, #tpu.memory_space<vmem>>, vector<1x8x128xf32>
    %136 = vector.shape_cast %135 : vector<1x8x128xf32> to vector<8x128xf32>
    %137 = arith.addf %136, %115 : vector<8x128xf32>
    %c2_45 = arith.constant 2 : index
    %c0_46 = arith.constant 0 : index
    %c0_47 = arith.constant 0 : index
    %138 = vector.load %arg5[%c2_45, %c0_46, %c0_47] : memref<10x8x128xf32, #tpu.memory_space<vmem>>, vector<1x8x128xf32>
    %139 = vector.shape_cast %138 : vector<1x8x128xf32> to vector<8x128xf32>
    %140 = vector.shape_cast %137 : vector<8x128xf32> to vector<1x8x128xf32>
    tpu.vector_store %arg5[%c2_45, %c0_46, %c0_47], %140 {strides = array<i32>} : memref<10x8x128xf32, #tpu.memory_space<vmem>>, vector<1x8x128xf32>,
    %c3 = arith.constant 3 : index
    %c0_48 = arith.constant 0 : index
    %c0_49 = arith.constant 0 : index
    %141 = vector.load %arg5[%c3, %c0_48, %c0_49] : memref<10x8x128xf32, #tpu.memory_space<vmem>>, vector<1x8x128xf32>
    %142 = vector.shape_cast %141 : vector<1x8x128xf32> to vector<8x128xf32>
    %143 = arith.addf %142, %116 : vector<8x128xf32>
    %c3_50 = arith.constant 3 : index
    %c0_51 = arith.constant 0 : index
    %c0_52 = arith.constant 0 : index
    %144 = vector.load %arg5[%c3_50, %c0_51, %c0_52] : memref<10x8x128xf32, #tpu.memory_space<vmem>>, vector<1x8x128xf32>
    %145 = vector.shape_cast %144 : vector<1x8x128xf32> to vector<8x128xf32>
    %146 = vector.shape_cast %143 : vector<8x128xf32> to vector<1x8x128xf32>
    tpu.vector_store %arg5[%c3_50, %c0_51, %c0_52], %146 {strides = array<i32>} : memref<10x8x128xf32, #tpu.memory_space<vmem>>, vector<1x8x128xf32>,
    %c4 = arith.constant 4 : index
    %c0_53 = arith.constant 0 : index
    %c0_54 = arith.constant 0 : index
    %147 = vector.load %arg5[%c4, %c0_53, %c0_54] : memref<10x8x128xf32, #tpu.memory_space<vmem>>, vector<1x8x128xf32>
    %148 = vector.shape_cast %147 : vector<1x8x128xf32> to vector<8x128xf32>
    %149 = arith.addf %148, %117 : vector<8x128xf32>
    %c4_55 = arith.constant 4 : index
    %c0_56 = arith.constant 0 : index
    %c0_57 = arith.constant 0 : index
    %150 = vector.load %arg5[%c4_55, %c0_56, %c0_57] : memref<10x8x128xf32, #tpu.memory_space<vmem>>, vector<1x8x128xf32>
    %151 = vector.shape_cast %150 : vector<1x8x128xf32> to vector<8x128xf32>
    %152 = vector.shape_cast %149 : vector<8x128xf32> to vector<1x8x128xf32>
    tpu.vector_store %arg5[%c4_55, %c0_56, %c0_57], %152 {strides = array<i32>} : memref<10x8x128xf32, #tpu.memory_space<vmem>>, vector<1x8x128xf32>,
    %c5 = arith.constant 5 : index
    %c0_58 = arith.constant 0 : index
    %c0_59 = arith.constant 0 : index
    %153 = vector.load %arg5[%c5, %c0_58, %c0_59] : memref<10x8x128xf32, #tpu.memory_space<vmem>>, vector<1x8x128xf32>
    %154 = vector.shape_cast %153 : vector<1x8x128xf32> to vector<8x128xf32>
    %155 = arith.addf %154, %118 : vector<8x128xf32>
    %c5_60 = arith.constant 5 : index
    %c0_61 = arith.constant 0 : index
    %c0_62 = arith.constant 0 : index
    %156 = vector.load %arg5[%c5_60, %c0_61, %c0_62] : memref<10x8x128xf32, #tpu.memory_space<vmem>>, vector<1x8x128xf32>
    %157 = vector.shape_cast %156 : vector<1x8x128xf32> to vector<8x128xf32>
    %158 = vector.shape_cast %155 : vector<8x128xf32> to vector<1x8x128xf32>
    tpu.vector_store %arg5[%c5_60, %c0_61, %c0_62], %158 {strides = array<i32>} : memref<10x8x128xf32, #tpu.memory_space<vmem>>, vector<1x8x128xf32>,
    %c6 = arith.constant 6 : index
    %c0_63 = arith.constant 0 : index
    %c0_64 = arith.constant 0 : index
    %159 = vector.load %arg5[%c6, %c0_63, %c0_64] : memref<10x8x128xf32, #tpu.memory_space<vmem>>, vector<1x8x128xf32>
    %160 = vector.shape_cast %159 : vector<1x8x128xf32> to vector<8x128xf32>
    %161 = arith.addf %160, %119 : vector<8x128xf32>
    %c6_65 = arith.constant 6 : index
    %c0_66 = arith.constant 0 : index
    %c0_67 = arith.constant 0 : index
    %162 = vector.load %arg5[%c6_65, %c0_66, %c0_67] : memref<10x8x128xf32, #tpu.memory_space<vmem>>, vector<1x8x128xf32>
    %163 = vector.shape_cast %162 : vector<1x8x128xf32> to vector<8x128xf32>
    %164 = vector.shape_cast %161 : vector<8x128xf32> to vector<1x8x128xf32>
    tpu.vector_store %arg5[%c6_65, %c0_66, %c0_67], %164 {strides = array<i32>} : memref<10x8x128xf32, #tpu.memory_space<vmem>>, vector<1x8x128xf32>,
    %c7 = arith.constant 7 : index
    %c0_68 = arith.constant 0 : index
    %c0_69 = arith.constant 0 : index
    %165 = vector.load %arg5[%c7, %c0_68, %c0_69] : memref<10x8x128xf32, #tpu.memory_space<vmem>>, vector<1x8x128xf32>
    %166 = vector.shape_cast %165 : vector<1x8x128xf32> to vector<8x128xf32>
    %167 = arith.addf %166, %120 : vector<8x128xf32>
    %c7_70 = arith.constant 7 : index
    %c0_71 = arith.constant 0 : index
    %c0_72 = arith.constant 0 : index
    %168 = vector.load %arg5[%c7_70, %c0_71, %c0_72] : memref<10x8x128xf32, #tpu.memory_space<vmem>>, vector<1x8x128xf32>
    %169 = vector.shape_cast %168 : vector<1x8x128xf32> to vector<8x128xf32>
    %170 = vector.shape_cast %167 : vector<8x128xf32> to vector<1x8x128xf32>
    tpu.vector_store %arg5[%c7_70, %c0_71, %c0_72], %170 {strides = array<i32>} : memref<10x8x128xf32, #tpu.memory_space<vmem>>, vector<1x8x128xf32>,
    %c8 = arith.constant 8 : index
    %c0_73 = arith.constant 0 : index
    %c0_74 = arith.constant 0 : index
    %171 = vector.load %arg5[%c8, %c0_73, %c0_74] : memref<10x8x128xf32, #tpu.memory_space<vmem>>, vector<1x8x128xf32>
    %172 = vector.shape_cast %171 : vector<1x8x128xf32> to vector<8x128xf32>
    %173 = arith.addf %172, %121 : vector<8x128xf32>
    %c8_75 = arith.constant 8 : index
    %c0_76 = arith.constant 0 : index
    %c0_77 = arith.constant 0 : index
    %174 = vector.load %arg5[%c8_75, %c0_76, %c0_77] : memref<10x8x128xf32, #tpu.memory_space<vmem>>, vector<1x8x128xf32>
    %175 = vector.shape_cast %174 : vector<1x8x128xf32> to vector<8x128xf32>
    %176 = vector.shape_cast %173 : vector<8x128xf32> to vector<1x8x128xf32>
    tpu.vector_store %arg5[%c8_75, %c0_76, %c0_77], %176 {strides = array<i32>} : memref<10x8x128xf32, #tpu.memory_space<vmem>>, vector<1x8x128xf32>,
    %c9 = arith.constant 9 : index
    %c0_78 = arith.constant 0 : index
    %c0_79 = arith.constant 0 : index
    %177 = vector.load %arg5[%c9, %c0_78, %c0_79] : memref<10x8x128xf32, #tpu.memory_space<vmem>>, vector<1x8x128xf32>
    %178 = vector.shape_cast %177 : vector<1x8x128xf32> to vector<8x128xf32>
    %179 = arith.addf %178, %122 : vector<8x128xf32>
    %c9_80 = arith.constant 9 : index
    %c0_81 = arith.constant 0 : index
    %c0_82 = arith.constant 0 : index
    %180 = vector.load %arg5[%c9_80, %c0_81, %c0_82] : memref<10x8x128xf32, #tpu.memory_space<vmem>>, vector<1x8x128xf32>
    %181 = vector.shape_cast %180 : vector<1x8x128xf32> to vector<8x128xf32>
    %182 = vector.shape_cast %179 : vector<8x128xf32> to vector<1x8x128xf32>
    tpu.vector_store %arg5[%c9_80, %c0_81, %c0_82], %182 {strides = array<i32>} : memref<10x8x128xf32, #tpu.memory_space<vmem>>, vector<1x8x128xf32>,
    %c0_i32_83 = arith.constant 0 : i32
    %183 = arith.cmpi eq, %arg0, %c0_i32_83 : i32
    %184 = arith.extui %183 : i1 to i32
    %c0_i32_84 = arith.constant 0 : i32
    %185 = arith.cmpi ne, %184, %c0_i32_84 : i32
    scf.if %185 {
      %c0_85 = arith.constant 0 : index
      %c0_86 = arith.constant 0 : index
      %c0_87 = arith.constant 0 : index
      %186 = vector.load %arg5[%c0_85, %c0_86, %c0_87] : memref<10x8x128xf32, #tpu.memory_space<vmem>>, vector<10x8x128xf32>
      %cst_88 = arith.constant dense<0.000000e+00> : vector<10x128xf32>
      %187 = vector.multi_reduction <add>, %186, %cst_88 [1] : vector<10x8x128xf32> to vector<10x128xf32>
      %188 = vector.shape_cast %187 : vector<10x128xf32> to vector<10x1x128xf32>
      %cst_89 = arith.constant dense<0.000000e+00> : vector<10x1xf32>
      %189 = vector.multi_reduction <add>, %188, %cst_89 [2] : vector<10x1x128xf32> to vector<10x1xf32>
      %190 = vector.shape_cast %189 : vector<10x1xf32> to vector<10x1x1xf32>
      %191 = vector.extract_strided_slice %190 {offsets = [0, 0, 0], sizes = [1, 1, 1], strides = [1, 1, 1]} : vector<10x1x1xf32> to vector<1x1x1xf32>
      %192 = vector.shape_cast %191 : vector<1x1x1xf32> to vector<1x1xf32>
      %cst_90 = arith.constant 1.250000e-01 : f32
      %193 = vector.broadcast %cst_90 : f32 to vector<1x1xf32>
      %194 = arith.mulf %192, %193 : vector<1x1xf32>
      %195 = vector.extract_strided_slice %190 {offsets = [1, 0, 0], sizes = [1, 1, 1], strides = [1, 1, 1]} : vector<10x1x1xf32> to vector<1x1x1xf32>
      %196 = vector.shape_cast %195 : vector<1x1x1xf32> to vector<1x1xf32>
      %cst_91 = arith.constant 1.250000e-01 : f32
      %197 = vector.broadcast %cst_91 : f32 to vector<1x1xf32>
      %198 = arith.mulf %196, %197 : vector<1x1xf32>
      %cst_92 = arith.constant 9.99999993E-9 : f32
      %199 = vector.broadcast %cst_92 : f32 to vector<1x1xf32>
      %200 = arith.addf %198, %199 : vector<1x1xf32>
      %201 = math.sqrt %200 : vector<1x1xf32>
      %202 = vector.extract_strided_slice %190 {offsets = [2, 0, 0], sizes = [1, 1, 1], strides = [1, 1, 1]} : vector<10x1x1xf32> to vector<1x1x1xf32>
      %203 = vector.shape_cast %202 : vector<1x1x1xf32> to vector<1x1xf32>
      %cst_93 = arith.constant 1.250000e-01 : f32
      %204 = vector.broadcast %cst_93 : f32 to vector<1x1xf32>
      %205 = arith.mulf %203, %204 : vector<1x1xf32>
      %206 = vector.extract_strided_slice %190 {offsets = [8, 0, 0], sizes = [1, 1, 1], strides = [1, 1, 1]} : vector<10x1x1xf32> to vector<1x1x1xf32>
      %207 = vector.shape_cast %206 : vector<1x1x1xf32> to vector<1x1xf32>
      %208 = vector.extract_strided_slice %190 {offsets = [7, 0, 0], sizes = [1, 1, 1], strides = [1, 1, 1]} : vector<10x1x1xf32> to vector<1x1x1xf32>
      %209 = vector.shape_cast %208 : vector<1x1x1xf32> to vector<1x1xf32>
      %210 = arith.divf %207, %209 : vector<1x1xf32>
      %211 = vector.extract_strided_slice %190 {offsets = [9, 0, 0], sizes = [1, 1, 1], strides = [1, 1, 1]} : vector<10x1x1xf32> to vector<1x1x1xf32>
      %212 = vector.shape_cast %211 : vector<1x1x1xf32> to vector<1x1xf32>
      %cst_94 = arith.constant 1.250000e-01 : f32
      %213 = vector.broadcast %cst_94 : f32 to vector<1x1xf32>
      %214 = arith.mulf %212, %213 : vector<1x1xf32>
      %215 = vector.extract_strided_slice %190 {offsets = [3, 0, 0], sizes = [1, 1, 1], strides = [1, 1, 1]} : vector<10x1x1xf32> to vector<1x1x1xf32>
      %216 = vector.shape_cast %215 : vector<1x1x1xf32> to vector<1x1xf32>
      %217 = vector.extract_strided_slice %190 {offsets = [5, 0, 0], sizes = [1, 1, 1], strides = [1, 1, 1]} : vector<10x1x1xf32> to vector<1x1x1xf32>
      %218 = vector.shape_cast %217 : vector<1x1x1xf32> to vector<1x1xf32>
      %cst_95 = arith.constant 1.250000e-01 : f32
      %219 = vector.broadcast %cst_95 : f32 to vector<1x1xf32>
      %220 = arith.mulf %216, %219 : vector<1x1xf32>
      %cst_96 = arith.constant 1.250000e-01 : f32
      %221 = vector.broadcast %cst_96 : f32 to vector<1x1xf32>
      %222 = arith.mulf %218, %221 : vector<1x1xf32>
      %223 = arith.subf %220, %222 : vector<1x1xf32>
      %224 = arith.mulf %223, %223 : vector<1x1xf32>
      %225 = vector.extract_strided_slice %190 {offsets = [4, 0, 0], sizes = [1, 1, 1], strides = [1, 1, 1]} : vector<10x1x1xf32> to vector<1x1x1xf32>
      %226 = vector.shape_cast %225 : vector<1x1x1xf32> to vector<1x1xf32>
      %227 = arith.mulf %216, %220 : vector<1x1xf32>
      %228 = arith.subf %226, %227 : vector<1x1xf32>
      %cst_97 = arith.constant 0.142857149 : f32
      %229 = vector.broadcast %cst_97 : f32 to vector<1x1xf32>
      %230 = arith.mulf %228, %229 : vector<1x1xf32>
      %cst_98 = arith.constant 0.000000e+00 : f32
      %231 = vector.broadcast %cst_98 : f32 to vector<1x1xf32>
      %232 = arith.maximumf %230, %231 : vector<1x1xf32>
      %233 = vector.extract_strided_slice %190 {offsets = [6, 0, 0], sizes = [1, 1, 1], strides = [1, 1, 1]} : vector<10x1x1xf32> to vector<1x1x1xf32>
      %234 = vector.shape_cast %233 : vector<1x1x1xf32> to vector<1x1xf32>
      %235 = arith.mulf %218, %222 : vector<1x1xf32>
      %236 = arith.subf %234, %235 : vector<1x1xf32>
      %cst_99 = arith.constant 0.142857149 : f32
      %237 = vector.broadcast %cst_99 : f32 to vector<1x1xf32>
      %238 = arith.mulf %236, %237 : vector<1x1xf32>
      %cst_100 = arith.constant 0.000000e+00 : f32
      %239 = vector.broadcast %cst_100 : f32 to vector<1x1xf32>
      %240 = arith.maximumf %238, %239 : vector<1x1xf32>
      %241 = math.sqrt %232 : vector<1x1xf32>
      %242 = math.sqrt %240 : vector<1x1xf32>
      %243 = arith.subf %241, %242 : vector<1x1xf32>
      %244 = arith.mulf %243, %243 : vector<1x1xf32>
      %245 = arith.addf %224, %244 : vector<1x1xf32>
      %cst_101 = arith.constant 1.000000e+00 : f32
      %246 = vector.broadcast %cst_101 : f32 to vector<1x1xf32>
      %247 = arith.mulf %246, %194 : vector<1x1xf32>
      %cst_102 = arith.constant 1.000000e+00 : f32
      %248 = vector.broadcast %cst_102 : f32 to vector<1x1xf32>
      %249 = arith.mulf %248, %210 : vector<1x1xf32>
      %250 = arith.addf %247, %249 : vector<1x1xf32>
      %cst_103 = arith.constant 5.000000e-01 : f32
      %251 = vector.broadcast %cst_103 : f32 to vector<1x1xf32>
      %252 = arith.mulf %251, %245 : vector<1x1xf32>
      %253 = arith.addf %250, %252 : vector<1x1xf32>
      %254 = tpu.iota {dimensions = array<i32: 1>} : vector<1x128xi32>
      %cst_104 = arith.constant 0.000000e+00 : f32
      %255 = vector.broadcast %cst_104 : f32 to vector<1x128xf32>
      %c0_i32_105 = arith.constant 0 : i32
      %256 = vector.broadcast %c0_i32_105 : i32 to vector<1x128xi32>
      %257 = arith.cmpi eq, %254, %256 : vector<1x128xi32>
      %258 = vector.shape_cast %253 : vector<1x1xf32> to vector<1x1xf32>
      %259 = vector.broadcast %258 : vector<1x1xf32> to vector<1x128xf32>
      %260 = arith.select %257, %259, %255 : vector<1x128xi1>, vector<1x128xf32>
      %c1_i32_106 = arith.constant 1 : i32
      %261 = vector.broadcast %c1_i32_106 : i32 to vector<1x128xi32>
      %262 = arith.cmpi eq, %254, %261 : vector<1x128xi32>
      %263 = vector.shape_cast %194 : vector<1x1xf32> to vector<1x1xf32>
      %264 = vector.broadcast %263 : vector<1x1xf32> to vector<1x128xf32>
      %265 = arith.select %262, %264, %260 : vector<1x128xi1>, vector<1x128xf32>
      %c2_i32_107 = arith.constant 2 : i32
      %266 = vector.broadcast %c2_i32_107 : i32 to vector<1x128xi32>
      %267 = arith.cmpi eq, %254, %266 : vector<1x128xi32>
      %268 = vector.shape_cast %201 : vector<1x1xf32> to vector<1x1xf32>
      %269 = vector.broadcast %268 : vector<1x1xf32> to vector<1x128xf32>
      %270 = arith.select %267, %269, %265 : vector<1x128xi1>, vector<1x128xf32>
      %c3_i32 = arith.constant 3 : i32
      %271 = vector.broadcast %c3_i32 : i32 to vector<1x128xi32>
      %272 = arith.cmpi eq, %254, %271 : vector<1x128xi32>
      %273 = vector.shape_cast %205 : vector<1x1xf32> to vector<1x1xf32>
      %274 = vector.broadcast %273 : vector<1x1xf32> to vector<1x128xf32>
      %275 = arith.select %272, %274, %270 : vector<1x128xi1>, vector<1x128xf32>
      %c4_i32 = arith.constant 4 : i32
      %276 = vector.broadcast %c4_i32 : i32 to vector<1x128xi32>
      %277 = arith.cmpi eq, %254, %276 : vector<1x128xi32>
      %278 = vector.shape_cast %210 : vector<1x1xf32> to vector<1x1xf32>
      %279 = vector.broadcast %278 : vector<1x1xf32> to vector<1x128xf32>
      %280 = arith.select %277, %279, %275 : vector<1x128xi1>, vector<1x128xf32>
      %c5_i32 = arith.constant 5 : i32
      %281 = vector.broadcast %c5_i32 : i32 to vector<1x128xi32>
      %282 = arith.cmpi eq, %254, %281 : vector<1x128xi32>
      %283 = vector.shape_cast %214 : vector<1x1xf32> to vector<1x1xf32>
      %284 = vector.broadcast %283 : vector<1x1xf32> to vector<1x128xf32>
      %285 = arith.select %282, %284, %280 : vector<1x128xi1>, vector<1x128xf32>
      %c6_i32 = arith.constant 6 : i32
      %286 = vector.broadcast %c6_i32 : i32 to vector<1x128xi32>
      %287 = arith.cmpi eq, %254, %286 : vector<1x128xi32>
      %288 = vector.shape_cast %245 : vector<1x1xf32> to vector<1x1xf32>
      %289 = vector.broadcast %288 : vector<1x1xf32> to vector<1x128xf32>
      %290 = arith.select %287, %289, %285 : vector<1x128xi1>, vector<1x128xf32>
      %c7_i32 = arith.constant 7 : i32
      %291 = vector.broadcast %c7_i32 : i32 to vector<1x128xi32>
      %292 = arith.cmpi eq, %254, %291 : vector<1x128xi32>
      %293 = vector.shape_cast %224 : vector<1x1xf32> to vector<1x1xf32>
      %294 = vector.broadcast %293 : vector<1x1xf32> to vector<1x128xf32>
      %295 = arith.select %292, %294, %290 : vector<1x128xi1>, vector<1x128xf32>
      %c8_i32_108 = arith.constant 8 : i32
      %296 = vector.broadcast %c8_i32_108 : i32 to vector<1x128xi32>
      %297 = arith.cmpi eq, %254, %296 : vector<1x128xi32>
      %298 = vector.shape_cast %244 : vector<1x1xf32> to vector<1x1xf32>
      %299 = vector.broadcast %298 : vector<1x1xf32> to vector<1x128xf32>
      %300 = arith.select %297, %299, %295 : vector<1x128xi1>, vector<1x128xf32>
      %c0_109 = arith.constant 0 : index
      %c0_110 = arith.constant 0 : index
      %301 = vector.load %arg4[%c0_109, %c0_110] : memref<1x128xf32, #tpu.memory_space<vmem>>, vector<1x128xf32>
      tpu.vector_store %arg4[%c0_109, %c0_110], %300 {strides = array<i32>} : memref<1x128xf32, #tpu.memory_space<vmem>>, vector<1x128xf32>,
    } else {
    }
    return
  }
  func.func @transform_0(%arg0: i32) -> (i32, i32) {
    %c0_i32 = arith.constant 0 : i32
    %c0_i32_0 = arith.constant 0 : i32
    return %arg0, %c0_i32 : i32, i32
  }
  func.func @transform_1(%arg0: i32) -> (i32, i32) {
    %c0_i32 = arith.constant 0 : i32
    %c0_i32_0 = arith.constant 0 : i32
    return %arg0, %c0_i32 : i32, i32
  }
  func.func @transform_2(%arg0: i32) -> (i32, i32, i32) {
    %c0_i32 = arith.constant 0 : i32
    %c0_i32_0 = arith.constant 0 : i32
    %c0_i32_1 = arith.constant 0 : i32
    return %c0_i32, %arg0, %c0_i32_0 : i32, i32, i32
  }
  func.func @transform_3(%arg0: i32) -> (i32, i32) {
    %c0_i32 = arith.constant 0 : i32
    %c0_i32_0 = arith.constant 0 : i32
    %c0_i32_1 = arith.constant 0 : i32
    return %c0_i32, %c0_i32_0 : i32, i32
  }
}

</mosaic_0001>

<bundles_post_ra>
// kernel: _loss_jit.1
= control target key start
LH: loop header
LB: loop body
LE: loop exit
PB: predicated region body
PF: predicated region fallthrough
CT: control target
= control target key end

     0   :  { %v82_v0 = vlaneseq  ;;  %v339_v11 = vmov 0   ;;  %v340_v26 = vmov 0.0   ;;  %v341_v32 = vmov 0.8   ;;  %s452_s0 = inlined_call_operand.vmem [shape: f32[8,128], index: 0, kind: input, shape index: {}]   ;;  %s453_s1 = inlined_call_operand.vmem [shape: f32[8,128], index: 1, kind: input, shape index: {}]   ;;  %s454_s2 = inlined_call_operand.vmem [shape: f32[3,8,128], index: 2, kind: input, shape index: {}]   ;;  %s455_s3 = inlined_call_operand.vmem [shape: f32[1,128], index: 3, kind: output, shape index: {}]  }
   0x1   :  { %v28_v1 = vld [vmem:[%s452_s0] sm:$0xff]  ;;  %v378_v7 = vld [vmem:[%s454_s2 + $0x8] sm:$0xff]  ;;  %v383_v8 = vld [vmem:[%s454_s2 + $0x10] sm:$0xff] }
   0x2   :  { %v29_v2 = vld [vmem:[%s453_s1] sm:$0xff]  ;;  %v83_v4 = vshrl.u32 %v82_v0, 7  ;;  %v373_v5 = vand.u32 127, %v82_v0  ;;  %v317_v16 = vadd.f32 -80.0, %v28_v1 }
   0x3   :  { %v371_v3 = vld [vmem:[%s454_s2] sm:$0xff]  ;;  %v33_v6 = vsub.f32 %v28_v1, %v29_v2  ;;  %vm41_vm0 = vcmp.ge.f32.partialorder %v29_v2, 60.0  ;;  %vm43_vm1 = vcmp.ge.f32.partialorder %v29_v2, 100.0  ;;  %v318_v18 = vadd.f32 -80.0, %v29_v2 }
   0x4   :  { %v48_v9 = vmax.f32 %v371_v3, %v378_v7  ;;  %v87_v10 = vmul.u32 128, %v83_v4  ;;  %v42_v12 = vsel %vm41_vm0, 1, %v339_v11  ;;  %v44_v13 = vsel %vm43_vm1, 1, %v339_v11 }
   0x5   :  { %v45_v14 = vadd.s32 %v44_v13, %v42_v12  ;;  %v40_v19 = vmul.f32 %v33_v6, %v33_v6  ;;  %v34_v24 = vand.u32 2147483647, %v33_v6  ;;  %v36_v25 = vmul.f32 0.5, %v33_v6 }
   0x6   :  { %v390_v15 = vmax.f32 %v48_v9, %v383_v8  ;;  %v90_v17 = vadd.s32 %v87_v10, %v373_v5  ;;  %vm292_vm0 = vcmp.eq.s32.totalorder %v373_v5, 0  ;;  %vm294_vm1 = vcmp.eq.s32.totalorder %v373_v5, 1 }
   0x7   :  { %vm46_vm2 = vcmp.lt.s32.totalorder %v45_v14, 2  ;;  %vm35_vm6 = vcmp.lt.f32.partialorder %v34_v24, 1.0  ;;  %v37_v49 = vmul.f32 %v36_v25, %v33_v6  ;;  %v315_v56 = vadd.f32 -0.5, %v34_v24 }
   0x8   :  { %v50_v20 = vsub.f32 %v371_v3, %v390_v15  ;;  %v53_v21 = vsub.f32 %v378_v7, %v390_v15  ;;  %v57_v22 = vsub.f32 %v383_v8, %v390_v15  ;;  %vm91_vm3 = vcmp.lt.s32.totalorder %v90_v17, 8 }
   0x9   :  { %v399_v23 = vsel %vm46_vm2, %v45_v14, 2  ;;  %v402_v27 = vsel %vm91_vm3, 1.0, %v340_v26  ;;  %v39_v0 = vsel %vm35_vm6, %v37_v49, %v315_v56  ;;  %vm71_vm7 = vcmp.eq.f32.partialorder %v383_v8, %v390_v15 }
   0xa   :  { %vm64_vm4 = vcmp.eq.s32.totalorder %v399_v23, 1  ;;  %vm67_vm5 = vcmp.eq.s32.totalorder %v399_v23, 2  ;;  %v51_v28 = vmul.f32 1.442695, %v50_v20  ;;  %v97_v29 = vmul.f32 %v402_v27, %v317_v16 }
   0xb   :  { %v98_v30 = vmul.f32 %v402_v27, %v318_v18  ;;  %v95_v31 = vmul.f32 %v402_v27, %v40_v19  ;;  %v66_v33 = vsel %vm64_vm4, 1.0, %v341_v32  ;;  %v54_v35 = vmul.f32 1.442695, %v53_v21 }
   0xc   :  { %v69_v34 = vsel %vm67_vm5, 1.2, %v66_v33  ;;  %323 = vpow2.f32 %v51_v28  ;;  %v58_v36 = vmul.f32 1.442695, %v57_v22  ;;  %v184_v37 = vrot.slane %v97_v29, 4 }
   0xd   :  { %v196_v38 = vrot.slane %v98_v30, 4  ;;  %v101_v39 = vmul.f32 %v97_v29, %v97_v29  ;;  %v102_v40 = vmul.f32 %v98_v30, %v98_v30  ;;  %v172_v41 = vrot.slane %v95_v31, 4 }
   0xe   :  { %v414_v42 = vmul.f32 %v402_v27, %v69_v34  ;;  %325 = vpow2.f32 %v54_v35  ;;  %v185_v43 = vadd.f32 %v184_v37, %v97_v29  ;;  %v96_v57 = vmul.f32 %v402_v27, %v34_v24 }
   0xf   :  { %v197_v44 = vadd.f32 %v196_v38, %v98_v30  ;;  %v190_v45 = vrot.slane %v101_v39, 4  ;;  %v202_v46 = vrot.slane %v102_v40, 4  ;;  %v173_v47 = vadd.f32 %v172_v41, %v95_v31 }
  0x10   :  { %v208_v48 = vrot.slane %v414_v42, 4  ;;  %327 = vpow2.f32 %v58_v36  ;;  %v186_v50 = vrot.slane %v185_v43, 2  ;;  %v178_v1 = vrot.slane %v96_v57, 4 }
  0x11   :  { %v198_v51 = vrot.slane %v197_v44, 2  ;;  %v191_v52 = vadd.f32 %v190_v45, %v101_v39  ;;  %v203_v53 = vadd.f32 %v202_v46, %v102_v40  ;;  %v174_v54 = vrot.slane %v173_v47, 2 }
  0x12   :  { %v209_v55 = vadd.f32 %v208_v48, %v414_v42  ;;  %v187_v58 = vadd.f32 %v186_v50, %v185_v43  ;;  %v94_v13 = vmul.f32 %v402_v27, %v39_v0  ;;  %v179_v14 = vadd.f32 %v178_v1, %v96_v57 }
  0x13   :  { %v199_v59 = vadd.f32 %v198_v51, %v197_v44  ;;  %v192_v60 = vrot.slane %v191_v52, 2  ;;  %v204_v61 = vrot.slane %v203_v53, 2  ;;  %v175_v62 = vadd.f32 %v174_v54, %v173_v47 }
  0x14   :  { %v210_v63 = vrot.slane %v209_v55, 2  ;;  %v188_v2 = vrot.slane %v187_v58, 1  ;;  %v166_v22 = vrot.slane %v94_v13, 4  ;;  %v180_v28 = vrot.slane %v179_v14, 2 }
  0x15   :  { %v200_v4 = vrot.slane %v199_v59, 1  ;;  %v193_v6 = vadd.f32 %v192_v60, %v191_v52  ;;  %v205_v9 = vadd.f32 %v204_v61, %v203_v53  ;;  %v176_v21 = vrot.slane %v175_v62, 1 }
  0x16   :  { %v324_v10 = vpop.eup %323  ;;  %v211_v12 = vadd.f32 %v210_v63, %v209_v55  ;;  %v189_v16 = vadd.f32 %v188_v2, %v187_v58  ;;  %v167_v31 = vadd.f32 %v166_v22, %v94_v13  ;;  %v72_v32 = vsel %vm71_vm7, 2, %v339_v11 }
  0x17   :  { %v194_v17 = vrot.slane %v193_v6, 1  ;;  %v206_v18 = vrot.slane %v205_v9, 1  ;;  %v201_v20 = vadd.f32 %v200_v4, %v199_v59  ;;  %vm73_vm8 = vcmp.eq.f32.partialorder %v378_v7, %v390_v15 }
  0x18   :  { %v326_v19 = vpop.eup %325  ;;  %232 = vadd.xlane.f32.xlu0 %v189_v16  ;;  %v212_v30 = vrot.slane %v211_v12, 1  ;;  %vm75_vm9 = vcmp.eq.f32.partialorder %v371_v3, %v390_v15  ;;  %v168_v35 = vrot.slane %v167_v31, 2  ;;  %v74_v36 = vsel %vm73_vm8, 1, %v72_v32 }
  0x19   :  { %v195_v24 = vadd.f32 %v194_v17, %v193_v6  ;;  %v56_v25 = vadd.f32 %v326_v19, %v324_v10  ;;  %v207_v33 = vadd.f32 %v206_v18, %v205_v9  ;;  %v177_v37 = vadd.f32 %v176_v21, %v175_v62 }
  0x1a   :  { %v328_v29 = vpop.eup %327  ;;  %v181_v38 = vadd.f32 %v180_v28, %v179_v14  ;;  %v76_v39 = vsel %vm75_vm9, 0, %v74_v36  ;;  %v169_v40 = vadd.f32 %v168_v35, %v167_v31  ;;  %v213_v11 = vadd.f32 %v212_v30, %v211_v12 }
  0x1b   :  { %234 = vadd.xlane.f32.xlu1 %v195_v24  ;;  %v60_v34 = vadd.f32 %v328_v29, %v56_v25  ;;  %vm77_vm10 = vcmp.eq.s32.totalorder %v76_v39, %v399_v23  ;;  %v65_v48 = vsel %vm64_vm4, %v378_v7, %v371_v3  ;;  %vm296_vm3 = vcmp.eq.s32.totalorder %v373_v5, 2 }
  0x1c   :  { %236 = vadd.xlane.f32.xlu0 %v201_v20  ;;  %v170_v41 = vrot.slane %v169_v40, 1  ;;  %v182_v43 = vrot.slane %v181_v38, 1  ;;  %v316_v44 = vsel %vm77_vm10, 1.0, %v340_v26  ;;  %v68_v52 = vsel %vm67_vm5, %v383_v8, %v65_v48 }
  0x1d   :  { %329 = vlog2.f32 %v60_v34  ;;  %v100_v46 = vmul.f32 %v402_v27, %v316_v44  ;;  %vm298_vm4 = vcmp.eq.s32.totalorder %v373_v5, 3  ;;  %vm300_vm5 = vcmp.eq.s32.totalorder %v373_v5, 4 }
  0x1e   :  { %v171_v45 = vadd.f32 %v170_v41, %v169_v40  ;;  %v183_v47 = vadd.f32 %v182_v43, %v181_v38  ;;  %vm302_vm6 = vcmp.eq.s32.totalorder %v373_v5, 5  ;;  %vm304_vm7 = vcmp.eq.s32.totalorder %v373_v5, 6 }
  0x1f   :  { %238 = vadd.xlane.f32.xlu1 %v207_v33  ;;  %v220_v51 = vrot.slane %v100_v46, 4  ;;  %vm306_vm8 = vcmp.eq.s32.totalorder %v373_v5, 7  ;;  %vm308_vm9 = vcmp.eq.s32.totalorder %v373_v5, 8 }
  0x20   :  { %228 = vadd.xlane.f32.xlu0 %v177_v37 }
  0x21   :  { %v221_v54 = vadd.f32 %v220_v51, %v100_v46 }
  0x23   :  { %240 = vadd.xlane.f32.xlu1 %v213_v11  ;;  %v222_v56 = vrot.slane %v221_v54, 2 }
  0x24   :  { %226 = vadd.xlane.f32.xlu0 %v171_v45 }
  0x25   :  { %v223_v59 = vadd.f32 %v222_v56, %v221_v54 }
  0x27   :  { %v330_v49 = vpop.eup %329  ;;  %v224_v60 = vrot.slane %v223_v59, 1 }
  0x28   :  { %v62_v50 = vmul.f32 0.6931472, %v330_v49  ;;  %230 = vadd.xlane.f32.xlu0 %v183_v47 }
  0x29   :  { %v225_v62 = vadd.f32 %v224_v60, %v223_v59 }
  0x2a   :  { %v63_v26 = vadd.f32 %v62_v50, %v390_v15 }
  0x2c   :  { %v70_v53 = vsub.f32 %v63_v26, %v68_v52 }
  0x2e   :  { %v103_v27 = vmul.f32 %v414_v42, %v70_v53 }
  0x30   :  { %v214_v55 = vrot.slane %v103_v27, 4 }
  0x32   :  { %v215_v57 = vadd.f32 %v214_v55, %v103_v27 }
  0x34   :  { %v216_v58 = vrot.slane %v215_v57, 2 }
  0x36   :  { %v217_v3 = vadd.f32 %v216_v58, %v215_v57 }
  0x38   :  { %v218_v7 = vrot.slane %v217_v3, 1 }
  0x3a   :  { %v219_v61 = vadd.f32 %v218_v7, %v217_v3 }
  0x3c   :  { %242 = vadd.xlane.f32.xlu1 %v219_v61 }
  0x40   :  { %244 = vadd.xlane.f32.xlu1 %v225_v62 }
  0xa5   :  { %v233_v8 = vpop.xlane.xlu0 %232 }
  0xa6   :  { %v260_v23 = vmul.f32 0.125, %v233_v8 }
  0xa8   :  { %v235_v63 = vpop.xlane.xlu1 %234  ;;  %v264_v15 = vmul.f32 %v260_v23, %v233_v8 }
  0xa9   :  { %v237_v0 = vpop.xlane.xlu0 %236 }
  0xaa   :  { %v261_v1 = vmul.f32 0.125, %v237_v0  ;;  %v265_v2 = vsub.f32 %v235_v63, %v264_v15 }
  0xac   :  { %v239_v42 = vpop.xlane.xlu1 %238  ;;  %v268_v4 = vmul.f32 %v261_v1, %v237_v0  ;;  %v266_v6 = vmul.f32 0.14285715, %v265_v2  ;;  %v262_v29 = vsub.f32 %v260_v23, %v261_v1 }
  0xad   :  { %v229_v13 = vpop.xlane.xlu0 %228 }
  0xae   :  { %v267_v9 = vmax.f32 %v266_v6, 0.0  ;;  %v269_v10 = vsub.f32 %v239_v42, %v268_v4  ;;  %v247_v16 = vmul.f32 0.125, %v229_v13  ;;  %v263_v36 = vmul.f32 %v262_v29, %v262_v29 }
  0xb0   :  { %331 = vrsqrt.f32 %v267_v9  ;;  %v270_v12 = vmul.f32 0.14285715, %v269_v10  ;;  %v248_v17 = vadd.f32 1e-08, %v247_v16  ;;  %v241_v18 = vpop.xlane.xlu1 %240  ;;  %vm274_vm11 = vcmp.eq.f32.partialorder %v267_v9, inf }
  0xb1   :  { %v277_v25 = vand.u32 2147483648, %v267_v9  ;;  %vm276_vm13 = vcmp.eq.f32.partialorder %v267_v9, 0.0  ;;  %v227_v34 = vpop.xlane.xlu0 %226 }
  0xb2   :  { %v271_v14 = vmax.f32 %v270_v12, 0.0  ;;  %v246_v40 = vmul.f32 0.125, %v227_v34  ;;  %vm251_vm15 = vcmp.eq.f32.partialorder %v248_v17, inf  ;;  %v254_v47 = vand.u32 2147483648, %v248_v17 }
  0xb3   :  { %vm253_vm2 = vcmp.eq.f32.partialorder %v248_v17, 0.0 }
  0xb4   :  { %333 = vrsqrt.f32 %v271_v14  ;;  %vm281_vm12 = vcmp.eq.f32.partialorder %v271_v14, inf  ;;  %v284_v28 = vand.u32 2147483648, %v271_v14  ;;  %vm283_vm14 = vcmp.eq.f32.partialorder %v271_v14, 0.0 }
  0xb5   :  { %335 = vrcp.f32 %v241_v18  ;;  %v231_v46 = vpop.xlane.xlu0 %230 }
  0xb6   :  { %337 = vrsqrt.f32 %v248_v17  ;;  %v256_v51 = vmul.f32 0.125, %v231_v46 }
  0xba   :  { %v332_v19 = vpop.eup %331 }
  0xbb   :  { %v273_v20 = vmul.f32 %v332_v19, %v267_v9 }
  0xbd   :  { %v275_v22 = vsel %vm274_vm11, %v267_v9, %v273_v20 }
  0xbe   :  { %v334_v21 = vpop.eup %333  ;;  %v278_v31 = vsel %vm276_vm13, %v277_v25, %v275_v22 }
  0xbf   :  { %v280_v24 = vmul.f32 %v334_v21, %v271_v14  ;;  %v336_v35 = vpop.eup %335 }
  0xc0   :  { %v338_v38 = vpop.eup %337 }
  0xc1   :  { %v282_v30 = vsel %vm281_vm12, %v271_v14, %v280_v24  ;;  %v250_v44 = vmul.f32 %v338_v38, %v248_v17 }
  0xc2   :  { %v285_v32 = vsel %vm283_vm14, %v284_v28, %v282_v30 }
  0xc3   :  { %v286_v33 = vsub.f32 %v278_v31, %v285_v32  ;;  %v252_v49 = vsel %vm251_vm15, %v248_v17, %v250_v44 }
  0xc4   :  { %v255_v53 = vsel %vm253_vm2, %v254_v47, %v252_v49 }
  0xc5   :  { %v287_v37 = vmul.f32 %v286_v33, %v286_v33 }
  0xc7   :  { %v288_v39 = vadd.f32 %v287_v37, %v263_v36 }
  0xc9   :  { %v243_v11 = vpop.xlane.xlu1 %242  ;;  %v290_v43 = vmul.f32 0.5, %v288_v39 }
  0xca   :  { %v258_v41 = vmul.f32 %v336_v35, %v243_v11 }
  0xcc   :  { %v289_v45 = vadd.f32 %v258_v41, %v246_v40 }
  0xcd   :  { %v245_v50 = vpop.xlane.xlu1 %244 }
  0xce   :  { %v291_v48 = vadd.f32 %v290_v43, %v289_v45  ;;  %v259_v54 = vmul.f32 0.125, %v245_v50 }
  0xd0   :  { %v293_v52 = vsel %vm292_vm0, %v291_v48, 0.0 }
  0xd1   :  { %v295_v26 = vsel %vm294_vm1, %v246_v40, %v293_v52 }
  0xd2   :  { %v297_v27 = vsel %vm296_vm3, %v255_v53, %v295_v26 }
  0xd3   :  { %v299_v55 = vsel %vm298_vm4, %v256_v51, %v297_v27 }
  0xd4   :  { %v301_v56 = vsel %vm300_vm5, %v258_v41, %v299_v55 }
  0xd5   :  { %v303_v57 = vsel %vm302_vm6, %v259_v54, %v301_v56 }
  0xd6   :  { %v305_v58 = vsel %vm304_vm7, %v288_v39, %v303_v57 }
  0xd7   :  { %v307_v59 = vsel %vm306_vm8, %v263_v36, %v305_v58 }
  0xd8   :  { %v309_v3 = vsel %vm308_vm9, %v287_v37, %v307_v59 }
  0xd9   :  { %310 = vst [vmem:[%s455_s3] sm:$0x1] %v309_v3 }

</bundles_post_ra>
